<compile_context>
chip_gen: v7x
topology: tpu7x:2x2x1
jax: 0.10.0
libtpu: 0.0.40
codegen_flags: <defaults>
</compile_context>

<pallas_src>
import jax
import jax.numpy as jnp
from jax import lax
from jax.experimental import pallas as pl
from jax.experimental.pallas import tpu as pltpu


# ----------------------------- configuration ------------------------------ #
FULL_IMAGE_RES = 16
TOKENS_PER_PATCH = 1
CODEBOOK_SIZE = 128
EMB_DIM = 32

SPECIAL_TOKEN_MAPPING = {"<SOS>": 0, "<BOS>": 1, "<EOS>": 2, "<PAD>": 3}
START_OF_PATCH_TOKEN_IDX = len(SPECIAL_TOKEN_MAPPING)                       # 4
START_OF_POS_TOKEN_IDX = START_OF_PATCH_TOKEN_IDX + CODEBOOK_SIZE * TOKENS_PER_PATCH
MAX_NUM_POS_TOKENS = FULL_IMAGE_RES ** 2
NUM_TOKENS = START_OF_POS_TOKEN_IDX + MAX_NUM_POS_TOKENS

LANE = 128                       # TPU lane width; N axis padded to this
MAX_TILE_N = 1024                # lane-axis tile, sized against v7x's 64 MiB VMEM
VMEM_LIMIT_BYTES = 32 * 1024 * 1024


def _round_up(a: int, b: int) -> int:
    return ((a + b - 1) // b) * b


# ------------------------------ Pallas kernel ------------------------------ #
def _vq_tokenize_kernel(x_ref, wct_ref, half_ref, posT_ref, out_ref):
    """Fused VQ patch-token + position-token kernel (one N tile per grid step).

    x_ref    : (TILE_N, F) f32  flattened patches, natural (N, F) layout
    wct_ref  : (K, F)      f32  fused weights: codebook @ enc_w.T   (grid-resident)
    half_ref : (K, 1)      f32  b . c_k - 0.5 * ||c_k||^2           (grid-resident)
    posT_ref : (2, TILE_N) f32  patch centre positions, transposed
    out_ref  : (2, TILE_N) i32  row 0: patch tokens, row 1: position tokens
    """
    # scores[k, n] = c_k . (W^T x_n): one MXU matmul, contracting on x's LAST dim
    # (trans_b form) so no host/VMEM transpose of x is needed; result is (K, N)
    # with the codebook on sublanes and patches lane-dense.
    scores = lax.dot_general(
        wct_ref[...], x_ref[...],
        dimension_numbers=(((1,), (1,)), ((), ())),
        preferred_element_type=jnp.float32)                       # (K, TILE_N)

    # argmin_k ||z_n - c_k||^2 == argmax_k (z_n . c_k - 0.5 ||c_k||^2); the
    # ||z_n||^2 term is argmin-invariant and half_ref folds the encoder bias,
    # so this is a single broadcast add.
    q = scores + half_ref[...]                                    # (K, TILE_N)

    # First-occurrence argmax over the codebook (sublane) axis -> (1, N) lane-dense.
    max_q = jnp.max(q, axis=0, keepdims=True)                     # (1, TILE_N)
    ids = lax.broadcasted_iota(jnp.int32, q.shape, 0)             # (K, TILE_N)
    # NOTE: the CODEBOOK_SIZE sentinel can only survive if an entire column is NaN.
    patch_idx = jnp.min(jnp.where(q >= max_q, ids, CODEBOOK_SIZE),
                        axis=0, keepdims=True)                    # (1, TILE_N)
    patch_tok = patch_idx + START_OF_PATCH_TOKEN_IDX

    # Position tokens (f32 VPU math, v5e-safe), fused into the same kernel.
    p = posT_ref[...]                                             # (2, TILE_N)
    px = jnp.round(p[0:1, :])
    py = jnp.round(p[1:2, :])
    pos_tok = (px + float(FULL_IMAGE_RES) * py
               + float(START_OF_POS_TOKEN_IDX)).astype(jnp.int32)

    out_ref[...] = jnp.concatenate([patch_tok, pos_tok], axis=0)  # (2, TILE_N)


# ------------------------------ wrappers ----------------------------------- #
def prepare_vq_weights(enc_w, enc_b, codebook):
    """Weight-load-time precompute (call ONCE, outside the per-call path)."""
    wct = jnp.dot(codebook, enc_w.T)                              # (K, F)
    half = (jnp.dot(codebook, enc_b)
            - 0.5 * jnp.sum(codebook * codebook, axis=-1)).reshape(-1, 1)  # (K, 1)
    return wct.astype(jnp.float32), half.astype(jnp.float32)


@jax.jit
def _tokenize_vq(patches_nchw, positions, wct, half):
    """-> (1 + 2N,) int32: [<BOS>, patch_0, pos_0, patch_1, pos_1, ...]."""
    n = patches_nchw.shape[0]
    k, f = wct.shape

    # Free reshape of contiguous NCHW; NO host transpose of x (kernel contracts
    # on the last dim). positions^T is a tiny (2, N) relayout.
    x = patches_nchw.reshape(n, -1).astype(jnp.float32)           # (N, F)
    posT = positions.astype(jnp.float32).T                        # (2, N)

    # Pad the lane axis so every tile / store is full-width and unmasked.
    tile_n = min(MAX_TILE_N, _round_up(n, LANE))
    n_pad = _round_up(n, tile_n)
    if n_pad != n:
        x = jnp.pad(x, ((0, n_pad - n), (0, 0)))
        posT = jnp.pad(posT, ((0, 0), (0, n_pad - n)))
    num_tiles = n_pad // tile_n

    cost = pl.CostEstimate(
        flops=2 * k * f * n_pad,
        transcendentals=0,
        bytes_accessed=(n_pad * f + k * f + k + 4 * n_pad) * 4)

    out = pl.pallas_call(
        _vq_tokenize_kernel,
        out_shape=jax.ShapeDtypeStruct((2, n_pad), jnp.int32),
        grid=(num_tiles,),
        in_specs=[
            pl.BlockSpec((tile_n, f), lambda i: (i, 0)),   # x tile (pipelined)
            pl.BlockSpec((k, f), lambda i: (0, 0)),        # WcT   (grid-resident)
            pl.BlockSpec((k, 1), lambda i: (0, 0)),        # half  (grid-resident)
            pl.BlockSpec((2, tile_n), lambda i: (0, i)),   # positions^T tile
        ],
        out_specs=pl.BlockSpec((2, tile_n), lambda i: (0, i)),
        compiler_params=pltpu.CompilerParams(
            dimension_semantics=("parallel",),   # independent tiles -> megacore on v7x
            vmem_limit_bytes=VMEM_LIMIT_BYTES),
        cost_estimate=cost,
    )(x, wct, half, posT)

    vq = out[:, :n].T.reshape(-1)    # interleave: [patch, pos, patch, pos, ...]
    bos = jnp.full((1,), SPECIAL_TOKEN_MAPPING["<BOS>"], jnp.int32)
    return jnp.concatenate([bos, vq], axis=0)


def tokenize(patches_nchw, positions, text_token_ids, wct, half):
    """Mirror of VQTokenizer.tokenize (tokens_per_patch == 1)."""
    vq_tokens = _tokenize_vq(patches_nchw, positions, wct, half)
    start_token = jnp.array([SPECIAL_TOKEN_MAPPING["<SOS>"]], dtype=jnp.int32)
    end_token = jnp.array([SPECIAL_TOKEN_MAPPING["<EOS>"]], dtype=jnp.int32)
    # TODO(synk): BERT WordPiece text tokenization is string processing with no
    # Pallas/JAX equivalent; deterministic token ids are passed in directly.
    text_tokens = text_token_ids.astype(jnp.int32)
    return start_token, text_tokens, vq_tokens, end_token


# ------------------------------- main -------------------------------------- #
if __name__ == "__main__":
    key = jax.random.PRNGKey(0)
    k_patch, k_pos, k_w, k_b, k_cb = jax.random.split(key, 5)

    num_patches = 8
    channels = 4
    patch_res = 8
    flat_dim = channels * patch_res * patch_res        # 256

    # inputs (NCHW patches, positions already scaled by full_image_res)
    patches = jax.random.normal(k_patch, (num_patches, channels, patch_res, patch_res),
                                dtype=jnp.float32)
    positions = jax.random.uniform(k_pos, (num_patches, 2), dtype=jnp.float32,
                                   minval=1.0, maxval=float(FULL_IMAGE_RES - 1))

    # deterministic synthetic VQ-VAE encoder params + codebook
    enc_w = jax.random.normal(k_w, (flat_dim, EMB_DIM), dtype=jnp.float32) * 0.05
    enc_b = jax.random.normal(k_b, (EMB_DIM,), dtype=jnp.float32) * 0.01
    codebook = jax.random.normal(k_cb, (CODEBOOK_SIZE, EMB_DIM), dtype=jnp.float32)

    # deterministic stand-in for BERT text tokens: [CLS], "a", "cat", [SEP]
    text_token_ids = jnp.array([101, 1037, 4937, 102], dtype=jnp.int32)

    # weight-load-time precompute (done once, outside the per-call path)
    wct, half = prepare_vq_weights(enc_w, enc_b, codebook)

    start_token, text_tokens, vq_tokens, end_token = tokenize(
        patches, positions, text_token_ids, wct, half)
    jax.block_until_ready((start_token, text_tokens, vq_tokens, end_token))

    # ---- reference check against the unfused (PyTorch-style) formulation ----
    x = patches.reshape(num_patches, -1)
    z = x @ enc_w + enc_b
    d = (jnp.sum(z * z, axis=-1, keepdims=True)
         - 2.0 * z @ codebook.T
         + jnp.sum(codebook * codebook, axis=-1)[None, :])
    ref_patch = jnp.argmin(d, axis=-1).astype(jnp.int32) + START_OF_PATCH_TOKEN_IDX
    ref_pos = (jnp.round(positions[:, 0]) + FULL_IMAGE_RES * jnp.round(positions[:, 1])
               + START_OF_POS_TOKEN_IDX).astype(jnp.int32)
    ref_vq = jnp.concatenate(
        [jnp.array([SPECIAL_TOKEN_MAPPING["<BOS>"]], jnp.int32),
         jnp.stack([ref_patch, ref_pos], axis=1).reshape(-1)])

    assert vq_tokens.shape == (1 + 2 * num_patches,)
    assert bool(jnp.all(vq_tokens == ref_vq))
    assert int(vq_tokens[0]) == SPECIAL_TOKEN_MAPPING["<BOS>"]
    patch_part = vq_tokens[1::2]
    pos_part = vq_tokens[2::2]
    assert bool(jnp.all((patch_part >= START_OF_PATCH_TOKEN_IDX)
                        & (patch_part < START_OF_POS_TOKEN_IDX)))
    assert bool(jnp.all((pos_part >= START_OF_POS_TOKEN_IDX)
                        & (pos_part < NUM_TOKENS)))

    print("KERNEL_OK")
</pallas_src>

<mosaic_0001>
module attributes {stable_mosaic.version = 11 : i64} {
  func.func @_vq_tokenize_kernel(%arg0: i32, %arg1: memref<128x256xf32, #tpu.memory_space<vmem>>, %arg2: memref<128x256xf32, #tpu.memory_space<vmem>>, %arg3: memref<128x1xf32, #tpu.memory_space<vmem>>, %arg4: memref<2x128xf32, #tpu.memory_space<vmem>>, %arg5: memref<2x128xi32, #tpu.memory_space<vmem>>) attributes {dimension_semantics = [#tpu.dimension_semantics<parallel>], iteration_bounds = array<i64: 1>, scalar_prefetch = 0 : i64, scratch_operands = 0 : i64, tpu.core_type = #tpu.core_type<tc>, window_params = [{transform_indices = @transform_0, window_bounds = array<i64: 128, 256>}, {pipeline_mode = #tpu.pipeline_mode<synchronous>, transform_indices = @transform_1, window_bounds = array<i64: 128, 256>}, {pipeline_mode = #tpu.pipeline_mode<synchronous>, transform_indices = @transform_2, window_bounds = array<i64: 128, 1>}, {transform_indices = @transform_3, window_bounds = array<i64: 2, 128>}, {transform_indices = @transform_4, window_bounds = array<i64: 2, 128>}]} {
    %c0 = arith.constant 0 : index
    %c0_0 = arith.constant 0 : index
    %0 = vector.load %arg2[%c0, %c0_0] : memref<128x256xf32, #tpu.memory_space<vmem>>, vector<128x256xf32>
    %c0_1 = arith.constant 0 : index
    %c0_2 = arith.constant 0 : index
    %1 = vector.load %arg1[%c0_1, %c0_2] : memref<128x256xf32, #tpu.memory_space<vmem>>, vector<128x256xf32>
    %cst = arith.constant dense<0.000000e+00> : vector<128x128xf32>
    %2 = tpu.matmul %0, %1, %cst {dimension_numbers = #tpu.dot_dimension_numbers<[1], [1], [0], [0], [0, 0, 1, 0], [], []>} : vector<128x256xf32>, vector<128x256xf32>, vector<128x128xf32> -> vector<128x128xf32>
    %c0_3 = arith.constant 0 : index
    %c0_4 = arith.constant 0 : index
    %3 = vector.load %arg3[%c0_3, %c0_4] : memref<128x1xf32, #tpu.memory_space<vmem>>, vector<128x1xf32>
    %4 = vector.broadcast %3 : vector<128x1xf32> to vector<128x128xf32>
    %5 = arith.addf %2, %4 : vector<128x128xf32>
    %cst_5 = arith.constant dense<0xFF800000> : vector<128xf32>
    %6 = vector.multi_reduction <maximumf>, %5, %cst_5 [0] : vector<128x128xf32> to vector<128xf32>
    %7 = vector.shape_cast %6 : vector<128xf32> to vector<1x128xf32>
    %8 = tpu.iota {dimensions = array<i32: 0>} : vector<128x128xi32>
    %9 = vector.broadcast %7 : vector<1x128xf32> to vector<128x128xf32>
    %10 = arith.cmpf oge, %5, %9 : vector<128x128xf32>
    %c128_i32 = arith.constant 128 : i32
    %11 = vector.broadcast %c128_i32 : i32 to vector<128x128xi32>
    %12 = arith.select %10, %8, %11 : vector<128x128xi1>, vector<128x128xi32>
    %cst_6 = arith.constant dense<2147483647> : vector<128xi32>
    %13 = vector.multi_reduction <minsi>, %12, %cst_6 [0] : vector<128x128xi32> to vector<128xi32>
    %14 = vector.shape_cast %13 : vector<128xi32> to vector<1x128xi32>
    %c4_i32 = arith.constant 4 : i32
    %15 = vector.broadcast %c4_i32 : i32 to vector<1x128xi32>
    %16 = arith.addi %14, %15 : vector<1x128xi32>
    %c0_7 = arith.constant 0 : index
    %c0_8 = arith.constant 0 : index
    %17 = vector.load %arg4[%c0_7, %c0_8] : memref<2x128xf32, #tpu.memory_space<vmem>>, vector<2x128xf32>
    %18 = vector.extract_strided_slice %17 {offsets = [0, 0], sizes = [1, 128], strides = [1, 1]} : vector<2x128xf32> to vector<1x128xf32>
    %19 = math.roundeven %18 : vector<1x128xf32>
    %20 = vector.extract_strided_slice %17 {offsets = [1, 0], sizes = [1, 128], strides = [1, 1]} : vector<2x128xf32> to vector<1x128xf32>
    %21 = math.roundeven %20 : vector<1x128xf32>
    %cst_9 = arith.constant 1.600000e+01 : f32
    %22 = vector.broadcast %cst_9 : f32 to vector<1x128xf32>
    %23 = arith.mulf %22, %21 : vector<1x128xf32>
    %24 = arith.addf %19, %23 : vector<1x128xf32>
    %cst_10 = arith.constant 1.320000e+02 : f32
    %25 = vector.broadcast %cst_10 : f32 to vector<1x128xf32>
    %26 = arith.addf %24, %25 : vector<1x128xf32>
    %27 = arith.fptosi %26 : vector<1x128xf32> to vector<1x128xi32>
    %28 = tpu.concatenate %16, %27 in 0 : vector<1x128xi32>, vector<1x128xi32> -> vector<2x128xi32>
    %c0_11 = arith.constant 0 : index
    %c0_12 = arith.constant 0 : index
    %29 = vector.load %arg5[%c0_11, %c0_12] : memref<2x128xi32, #tpu.memory_space<vmem>>, vector<2x128xi32>
    tpu.vector_store %arg5[%c0_11, %c0_12], %28 {strides = array<i32>} : memref<2x128xi32, #tpu.memory_space<vmem>>, vector<2x128xi32>,
    return
  }
  func.func @transform_0(%arg0: i32) -> (i32, i32) {
    %c0_i32 = arith.constant 0 : i32
    %c0_i32_0 = arith.constant 0 : i32
    return %arg0, %c0_i32 : i32, i32
  }
  func.func @transform_1(%arg0: i32) -> (i32, i32) {
    %c0_i32 = arith.constant 0 : i32
    %c0_i32_0 = arith.constant 0 : i32
    %c0_i32_1 = arith.constant 0 : i32
    return %c0_i32, %c0_i32_0 : i32, i32
  }
  func.func @transform_2(%arg0: i32) -> (i32, i32) {
    %c0_i32 = arith.constant 0 : i32
    %c0_i32_0 = arith.constant 0 : i32
    %c0_i32_1 = arith.constant 0 : i32
    return %c0_i32, %c0_i32_0 : i32, i32
  }
  func.func @transform_3(%arg0: i32) -> (i32, i32) {
    %c0_i32 = arith.constant 0 : i32
    %c0_i32_0 = arith.constant 0 : i32
    return %c0_i32, %arg0 : i32, i32
  }
  func.func @transform_4(%arg0: i32) -> (i32, i32) {
    %c0_i32 = arith.constant 0 : i32
    %c0_i32_0 = arith.constant 0 : i32
    return %c0_i32, %arg0 : i32, i32
  }
}

</mosaic_0001>

<bundles_post_ra>
// kernel: _tokenize_vq.1
= control target key start
LH: loop header
LB: loop body
LE: loop exit
PB: predicated region body
PF: predicated region fallthrough
CT: control target
= control target key end

     0   :  { %v503_v3 = vmov 0   ;;  %s871_s0 = inlined_call_operand.vmem [shape: f32[128,256], index: 0, kind: input, shape index: {}]   ;;  %s872_s1 = inlined_call_operand.vmem [shape: f32[128,256], index: 1, kind: input, shape index: {}]   ;;  %s873_s2 = inlined_call_operand.vmem [shape: f32[128,1], index: 2, kind: input, shape index: {}]   ;;  %s874_s3 = inlined_call_operand.vmem [shape: f32[2,128], index: 3, kind: input, shape index: {}]   ;;  %s875_s4 = inlined_call_operand.vmem [shape: s32[2,128], index: 4, kind: output, shape index: {}]  }
   0x1   :  { %v50_v0 = vld [vmem:[%s871_s0 + $0x8] sm:$0xff]  ;;  %v52_v1 = vld [vmem:[%s871_s0 + $0x18] sm:$0xff]  ;;  %v49_v2 = vld [vmem:[%s871_s0] sm:$0xff]  ;;  %502 = vset.pattern.permute.xlu1 %v503_v3  ;;  %501 = vset.pattern.permute.xlu0 %v503_v3 }
   0x2   :  { %v449_v4 = vpack.c.bf16 %v52_v1, %v50_v0  ;;  %v51_v5 = vld [vmem:[%s871_s0 + $0x10] sm:$0xff]  ;;  %v54_v6 = vld [vmem:[%s871_s0 + $0x28] sm:$0xff]  ;;  %v56_v7 = vld [vmem:[%s871_s0 + $0x38] sm:$0xff] }
   0x3   :  { %v451_v8 = vpack.c.bf16 %v51_v5, %v49_v2  ;;  %v453_v9 = vpack.c.bf16 %v56_v7, %v54_v6  ;;  %v53_v10 = vld [vmem:[%s871_s0 + $0x20] sm:$0xff]  ;;  %v55_v11 = vld [vmem:[%s871_s0 + $0x30] sm:$0xff]  ;;  %v58_v12 = vld [vmem:[%s871_s0 + $0x48] sm:$0xff] }
   0x4   :  { %450 = vmatprep.subr.bf16.mxu0 %v449_v4  ;;  %481 = vmatprep.subr.bf16.mxu1 %v449_v4  ;;  %v60_v13 = vld [vmem:[%s871_s0 + $0x58] sm:$0xff]  ;;  %v455_v14 = vpack.c.bf16 %v55_v11, %v53_v10  ;;  %v18_v16 = vld [vmem:[%s872_s1 + $0x8] sm:$0xff]  ;;  %v57_v18 = vld [vmem:[%s871_s0 + $0x40] sm:$0xff] }
   0x5   :  { %452 = vmatpush1.bf16.xpose.msra.mxu0 %v451_v8  ;;  %489 = vmatpush1.bf16.xpose.msra.mxu1 %v451_v8  ;;  %v457_v15 = vpack.c.bf16 %v60_v13, %v58_v12  ;;  %v34_v17 = vld [vmem:[%s872_s1 + $0x88] sm:$0xff]  ;;  %v59_v19 = vld [vmem:[%s871_s0 + $0x50] sm:$0xff]  ;;  %v64_v21 = vld [vmem:[%s871_s0 + $0x78] sm:$0xff] }
   0x6   :  { %454 = vmatprep.subr.bf16.mxu0 %v453_v9  ;;  %482 = vmatprep.subr.bf16.mxu1 %v453_v9  ;;  %v62_v20 = vld [vmem:[%s871_s0 + $0x68] sm:$0xff]  ;;  %v459_v22 = vpack.c.bf16 %v59_v19, %v57_v18  ;;  %v61_v24 = vld [vmem:[%s871_s0 + $0x60] sm:$0xff]  ;;  %v63_v25 = vld [vmem:[%s871_s0 + $0x70] sm:$0xff] }
   0x7   :  { %241 = vmatprep.mubr.f32.mxu0 %v18_v16  ;;  %281 = vmatprep.mubr.f32.mxu1 %v34_v17  ;;  %v461_v23 = vpack.c.bf16 %v64_v21, %v62_v20  ;;  %v83_v26 = vld [vmem:[%s873_s2 + $0x10] sm:$0xff]  ;;  %v81_v27 = vld [vmem:[%s873_s2] sm:$0xff]  ;;  %v66_v28 = vld [vmem:[%s871_s0 + $0x88] sm:$0xff]  ;;  %v463_v32 = vpack.c.bf16 %v63_v25, %v61_v24 }
   0x8   :  { %v68_v29 = vld [vmem:[%s871_s0 + $0x98] sm:$0xff]  ;;  %109 = vperm.xlu1 %502, %v83_v26   ;;  %99 = vperm.xlu0 %501, %v81_v27   ;;  %v82_v31 = vld [vmem:[%s873_s2 + $0x8] sm:$0xff]  ;;  %v85_v35 = vld [vmem:[%s873_s2 + $0x20] sm:$0xff] }
   0x9   :  { %v84_v30 = vld [vmem:[%s873_s2 + $0x18] sm:$0xff]  ;;  %v465_v33 = vpack.c.bf16 %v68_v29, %v66_v28  ;;  %v86_v34 = vld [vmem:[%s873_s2 + $0x28] sm:$0xff]  ;;  %v65_v36 = vld [vmem:[%s871_s0 + $0x80] sm:$0xff] }
   0xa   :  { %v67_v37 = vld [vmem:[%s871_s0 + $0x90] sm:$0xff]  ;;  %v70_v38 = vld [vmem:[%s871_s0 + $0xa8] sm:$0xff]  ;;  %v72_v39 = vld [vmem:[%s871_s0 + $0xb8] sm:$0xff] }
   0xb   :  { %v88_v40 = vld [vmem:[%s873_s2 + $0x38] sm:$0xff]  ;;  %v87_v41 = vld [vmem:[%s873_s2 + $0x30] sm:$0xff]  ;;  %v467_v42 = vpack.c.bf16 %v67_v37, %v65_v36  ;;  %v469_v43 = vpack.c.bf16 %v72_v39, %v70_v38  ;;  %v90_v44 = vld [vmem:[%s873_s2 + $0x48] sm:$0xff] }
   0xc   :  { %114 = vperm.xlu1 %502, %v84_v30   ;;  %104 = vperm.xlu0 %501, %v82_v31   ;;  %v89_v45 = vld [vmem:[%s873_s2 + $0x40] sm:$0xff]  ;;  %v71_v47 = vld [vmem:[%s871_s0 + $0xb0] sm:$0xff]  ;;  %v74_v48 = vld [vmem:[%s871_s0 + $0xc8] sm:$0xff] }
   0xd   :  { %456 = vmatpush1.bf16.xpose.msra.mxu0 %v455_v14  ;;  %490 = vmatpush1.bf16.xpose.msra.mxu1 %v455_v14  ;;  %v69_v46 = vld [vmem:[%s871_s0 + $0xa0] sm:$0xff]  ;;  %v76_v49 = vld [vmem:[%s871_s0 + $0xd8] sm:$0xff]  ;;  %v91_v51 = vld [vmem:[%s873_s2 + $0x50] sm:$0xff] }
   0xe   :  { %458 = vmatprep.subr.bf16.mxu0 %v457_v15  ;;  %483 = vmatprep.subr.bf16.mxu1 %v457_v15  ;;  %v92_v50 = vld [vmem:[%s873_s2 + $0x58] sm:$0xff]  ;;  %v471_v52 = vpack.c.bf16 %v71_v47, %v69_v46  ;;  %v473_v53 = vpack.c.bf16 %v76_v49, %v74_v48  ;;  %v94_v54 = vld [vmem:[%s873_s2 + $0x68] sm:$0xff]  ;;  %v93_v55 = vld [vmem:[%s873_s2 + $0x60] sm:$0xff] }
   0xf   :  { %v73_v56 = vld [vmem:[%s871_s0 + $0xc0] sm:$0xff]  ;;  %v75_v57 = vld [vmem:[%s871_s0 + $0xd0] sm:$0xff]  ;;  %v78_v58 = vld [vmem:[%s871_s0 + $0xe8] sm:$0xff] }
  0x10   :  { %124 = vperm.xlu1 %502, %v86_v34   ;;  %119 = vperm.xlu0 %501, %v85_v35   ;;  %v80_v59 = vld [vmem:[%s871_s0 + $0xf8] sm:$0xff]  ;;  %v95_v61 = vld [vmem:[%s873_s2 + $0x70] sm:$0xff]  ;;  %v475_v62 = vpack.c.bf16 %v75_v57, %v73_v56  ;;  %v77_v0 = vld [vmem:[%s871_s0 + $0xe0] sm:$0xff] }
  0x11   :  { %v96_v60 = vld [vmem:[%s873_s2 + $0x78] sm:$0xff]  ;;  %v477_v63 = vpack.c.bf16 %v80_v59, %v78_v58  ;;  %v79_v1 = vld [vmem:[%s871_s0 + $0xf0] sm:$0xff]  ;;  %v17_v3 = vld [vmem:[%s872_s1] sm:$0xff] }
  0x12   :  { %v479_v2 = vpack.c.bf16 %v79_v1, %v77_v0  ;;  %v33_v4 = vld [vmem:[%s872_s1 + $0x80] sm:$0xff]  ;;  %v20_v5 = vld [vmem:[%s872_s1 + $0x18] sm:$0xff]  ;;  %v19_v7 = vld [vmem:[%s872_s1 + $0x10] sm:$0xff] }
  0x13   :  { %v36_v6 = vld [vmem:[%s872_s1 + $0x98] sm:$0xff]  ;;  %v35_v8 = vld [vmem:[%s872_s1 + $0x90] sm:$0xff]  ;;  %v22_v9 = vld [vmem:[%s872_s1 + $0x28] sm:$0xff] }
  0x14   :  { %134 = vperm.xlu1 %502, %v88_v40   ;;  %129 = vperm.xlu0 %501, %v87_v41   ;;  %v38_v10 = vld [vmem:[%s872_s1 + $0xa8] sm:$0xff]  ;;  %v21_v11 = vld [vmem:[%s872_s1 + $0x20] sm:$0xff]  ;;  %v24_v13 = vld [vmem:[%s872_s1 + $0x38] sm:$0xff] }
  0x15   :  { %460 = vmatpush1.bf16.xpose.msra.mxu0 %v459_v22  ;;  %491 = vmatpush1.bf16.xpose.msra.mxu1 %v459_v22  ;;  %v37_v12 = vld [vmem:[%s872_s1 + $0xa0] sm:$0xff]  ;;  %v40_v14 = vld [vmem:[%s872_s1 + $0xb8] sm:$0xff]  ;;  %v23_v15 = vld [vmem:[%s872_s1 + $0x30] sm:$0xff] }
  0x16   :  { %462 = vmatprep.subr.bf16.mxu0 %v461_v23  ;;  %484 = vmatprep.subr.bf16.mxu1 %v461_v23  ;;  %v39_v16 = vld [vmem:[%s872_s1 + $0xb0] sm:$0xff]  ;;  %v26_v17 = vld [vmem:[%s872_s1 + $0x48] sm:$0xff]  ;;  %v25_v19 = vld [vmem:[%s872_s1 + $0x40] sm:$0xff] }
  0x17   :  { %v42_v18 = vld [vmem:[%s872_s1 + $0xc8] sm:$0xff]  ;;  %v41_v20 = vld [vmem:[%s872_s1 + $0xc0] sm:$0xff]  ;;  %v28_v21 = vld [vmem:[%s872_s1 + $0x58] sm:$0xff] }
  0x18   :  { %144 = vperm.xlu1 %502, %v90_v44   ;;  %139 = vperm.xlu0 %501, %v89_v45   ;;  %v44_v22 = vld [vmem:[%s872_s1 + $0xd8] sm:$0xff]  ;;  %v27_v23 = vld [vmem:[%s872_s1 + $0x50] sm:$0xff]  ;;  %v30_v25 = vld [vmem:[%s872_s1 + $0x68] sm:$0xff] }
  0x19   :  { %v43_v24 = vld [vmem:[%s872_s1 + $0xd0] sm:$0xff]  ;;  %v46_v26 = vld [vmem:[%s872_s1 + $0xe8] sm:$0xff]  ;;  %v29_v27 = vld [vmem:[%s872_s1 + $0x60] sm:$0xff] }
  0x1a   :  { %v45_v28 = vld [vmem:[%s872_s1 + $0xe0] sm:$0xff]  ;;  %v32_v29 = vld [vmem:[%s872_s1 + $0x78] sm:$0xff]  ;;  %v31_v31 = vld [vmem:[%s872_s1 + $0x70] sm:$0xff] }
  0x1b   :  { %v48_v30 = vld [vmem:[%s872_s1 + $0xf8] sm:$0xff] }
  0x1c   :  { %154 = vperm.xlu1 %502, %v92_v50   ;;  %149 = vperm.xlu0 %501, %v91_v51  }
  0x1d   :  { %464 = vmatpush1.bf16.xpose.msra.mxu0 %v463_v32  ;;  %492 = vmatpush1.bf16.xpose.msra.mxu1 %v463_v32  ;;  %v47_v32 = vld [vmem:[%s872_s1 + $0xf0] sm:$0xff] }
  0x1e   :  { %466 = vmatprep.subr.bf16.mxu0 %v465_v33  ;;  %485 = vmatprep.subr.bf16.mxu1 %v465_v33 }
  0x20   :  { %164 = vperm.xlu1 %502, %v94_v54   ;;  %159 = vperm.xlu0 %501, %v93_v55  }
  0x24   :  { %174 = vperm.xlu1 %502, %v96_v60   ;;  %169 = vperm.xlu0 %501, %v95_v61  }
  0x25   :  { %468 = vmatpush1.bf16.xpose.msra.mxu0 %v467_v42  ;;  %493 = vmatpush1.bf16.xpose.msra.mxu1 %v467_v42 }
  0x26   :  { %470 = vmatprep.subr.bf16.mxu0 %v469_v43  ;;  %486 = vmatprep.subr.bf16.mxu1 %v469_v43 }
  0x2d   :  { %472 = vmatpush1.bf16.xpose.msra.mxu0 %v471_v52  ;;  %494 = vmatpush1.bf16.xpose.msra.mxu1 %v471_v52 }
  0x2e   :  { %474 = vmatprep.subr.bf16.mxu0 %v473_v53  ;;  %487 = vmatprep.subr.bf16.mxu1 %v473_v53 }
  0x35   :  { %476 = vmatpush1.bf16.xpose.msra.mxu0 %v475_v62  ;;  %495 = vmatpush1.bf16.xpose.msra.mxu1 %v475_v62 }
  0x36   :  { %478 = vmatprep.subr.bf16.mxu0 %v477_v63  ;;  %488 = vmatprep.subr.bf16.mxu1 %v477_v63 }
  0x3d   :  { %480 = vmatpush1.bf16.xpose.msra.mxu0 %v479_v2  ;;  %496 = vmatpush1.bf16.xpose.msra.mxu1 %v479_v2 }
  0x44   :  { %242 = vmatmul.mubr.f32.vlgmr.msra.gmra.mrb[0].mxu0 %v17_v3  ;;  %282 = vmatmul.mubr.f32.vlgmr.msra.gmra.mrb[0].mxu1 %v33_v4 }
  0x45   :  { %246 = vmatprep.mubr.f32.mxu0 %v20_v5  ;;  %286 = vmatprep.mubr.f32.mxu1 %v36_v6 }
  0x48   :  { %247 = vmatmul.mubr.f32.gmra.mrb[2].mxu0 %v19_v7  ;;  %287 = vmatmul.mubr.f32.gmra.mrb[2].mxu1 %v35_v8 }
  0x49   :  { %251 = vmatprep.mubr.f32.mxu0 %v22_v9  ;;  %291 = vmatprep.mubr.f32.mxu1 %v38_v10 }
  0x4c   :  { %252 = vmatmul.mubr.f32.gmra.mrb[4].mxu0 %v21_v11  ;;  %292 = vmatmul.mubr.f32.gmra.mrb[4].mxu1 %v37_v12 }
  0x4d   :  { %256 = vmatprep.mubr.f32.mxu0 %v24_v13  ;;  %296 = vmatprep.mubr.f32.mxu1 %v40_v14 }
  0x50   :  { %257 = vmatmul.mubr.f32.gmra.mrb[6].mxu0 %v23_v15  ;;  %297 = vmatmul.mubr.f32.gmra.mrb[6].mxu1 %v39_v16 }
  0x51   :  { %261 = vmatprep.mubr.f32.mxu0 %v26_v17  ;;  %301 = vmatprep.mubr.f32.mxu1 %v42_v18 }
  0x54   :  { %262 = vmatmul.mubr.f32.gmra.mrb[8].mxu0 %v25_v19  ;;  %302 = vmatmul.mubr.f32.gmra.mrb[8].mxu1 %v41_v20 }
  0x55   :  { %266 = vmatprep.mubr.f32.mxu0 %v28_v21  ;;  %306 = vmatprep.mubr.f32.mxu1 %v44_v22 }
  0x58   :  { %267 = vmatmul.mubr.f32.gmra.mrb[10].mxu0 %v27_v23  ;;  %307 = vmatmul.mubr.f32.gmra.mrb[10].mxu1 %v43_v24 }
  0x59   :  { %271 = vmatprep.mubr.f32.mxu0 %v30_v25  ;;  %311 = vmatprep.mubr.f32.mxu1 %v46_v26 }
  0x5c   :  { %272 = vmatmul.mubr.f32.gmra.mrb[12].mxu0 %v29_v27  ;;  %312 = vmatmul.mubr.f32.gmra.mrb[12].mxu1 %v45_v28 }
  0x5d   :  { %276 = vmatprep.mubr.f32.mxu0 %v32_v29  ;;  %316 = vmatprep.mubr.f32.mxu1 %v48_v30 }
  0x60   :  { %277 = vmatmul.mubr.f32.gmra.mrb[14].mxu0 %v31_v31  ;;  %317 = vmatmul.mubr.f32.gmra.mrb[14].mxu1 %v47_v32 }
  0x87   :  { %v100_v33 = vpop.permute.xlu0 %99  ;;  %v110_v34 = vpop.permute.xlu1 %109 }
  0x8b   :  { %v105_v35 = vpop.permute.xlu0 %104  ;;  %v115_v36 = vpop.permute.xlu1 %114 }
  0x8f   :  { %v120_v37 = vpop.permute.xlu0 %119  ;;  %v125_v38 = vpop.permute.xlu1 %124 }
  0x93   :  { %v130_v39 = vpop.permute.xlu0 %129  ;;  %v135_v40 = vpop.permute.xlu1 %134 }
  0x97   :  { %v140_v45 = vpop.permute.xlu0 %139  ;;  %v145_v50 = vpop.permute.xlu1 %144 }
  0x9b   :  { %v150_v55 = vpop.permute.xlu0 %149  ;;  %v155_v60 = vpop.permute.xlu1 %154 }
  0x9f   :  { %v160_v3 = vpop.permute.xlu0 %159  ;;  %v165_v14 = vpop.permute.xlu1 %164 }
  0xa3   :  { %v170_v26 = vpop.permute.xlu0 %169 }
 0x117   :  { %v243_v41 = vpop.f32.mrb[0].mxu0  ;;  %v283_v42 = vpop.f32.mrb[0].mxu1 }
 0x118   :  { %v245_v43 = vpop.f32.mrb[1].mxu0  ;;  %v285_v44 = vpop.f32.mrb[1].mxu1  ;;  %v769_v63 = vadd.f32 %v243_v41, %v100_v33  ;;  %v773_v4 = vadd.f32 %v283_v42, %v140_v45 }
 0x11b   :  { %v248_v46 = vpop.f32.mrb[2].mxu0  ;;  %v288_v47 = vpop.f32.mrb[2].mxu1 }
 0x11c   :  { %v250_v48 = vpop.f32.mrb[3].mxu0  ;;  %v290_v49 = vpop.f32.mrb[3].mxu1  ;;  %v777_v8 = vadd.f32 %v248_v46, %v105_v35  ;;  %v784_v15 = vadd.f32 %v288_v47, %v145_v50 }
 0x11d   :  { %v343_v49 = vlaneseq }
 0x11f   :  { %v253_v51 = vpop.f32.mrb[4].mxu0  ;;  %v293_v52 = vpop.f32.mrb[4].mxu1 }
 0x120   :  { %v255_v53 = vpop.f32.mrb[5].mxu0  ;;  %v295_v54 = vpop.f32.mrb[5].mxu1  ;;  %v789_v20 = vadd.f32 %v253_v51, %v110_v34  ;;  %v796_v27 = vadd.f32 %v293_v52, %v150_v55 }
 0x121   :  { %v344_v53 = vshrl.u32 %v343_v49, 7 }
 0x123   :  { %v258_v56 = vpop.f32.mrb[6].mxu0  ;;  %v298_v57 = vpop.f32.mrb[6].mxu1 }
 0x124   :  { %v260_v58 = vpop.f32.mrb[7].mxu0  ;;  %v300_v59 = vpop.f32.mrb[7].mxu1  ;;  %v801_v30 = vadd.f32 %v258_v56, %v115_v36  ;;  %v808_v41 = vadd.f32 %v298_v57, %v155_v60  ;;  %v345_v57 = vadd.s32 8, %v344_v53 }
 0x125   :  { %v175_v36 = vpop.permute.xlu1 %174  ;;  %v346_v58 = vadd.s32 16, %v344_v53 }
 0x127   :  { %v263_v61 = vpop.f32.mrb[8].mxu0  ;;  %v303_v62 = vpop.f32.mrb[8].mxu1 }
 0x128   :  { %v771_v0 = vadd.f32 %v263_v61, %v120_v37  ;;  %v265_v1 = vpop.f32.mrb[9].mxu0  ;;  %v305_v2 = vpop.f32.mrb[9].mxu1  ;;  %v779_v9 = vadd.f32 %v303_v62, %v160_v3  ;;  %v347_v61 = vadd.s32 24, %v344_v53  ;;  %v348_v62 = vadd.s32 32, %v344_v53 }
 0x129   :  { %v349_v1 = vadd.s32 40, %v344_v53  ;;  %v350_v2 = vadd.s32 48, %v344_v53  ;;  %v351_v3 = vadd.s32 56, %v344_v53 }
 0x12a   :  { %v322_v5 = vmax.f32 %v769_v63, %v771_v0 }
 0x12b   :  { %v268_v6 = vpop.f32.mrb[10].mxu0  ;;  %v308_v7 = vpop.f32.mrb[10].mxu1 }
 0x12c   :  { %v326_v10 = vmax.f32 %v322_v5, %v773_v4  ;;  %v782_v11 = vadd.f32 %v268_v6, %v125_v38  ;;  %v270_v12 = vpop.f32.mrb[11].mxu0  ;;  %v310_v13 = vpop.f32.mrb[11].mxu1  ;;  %v791_v21 = vadd.f32 %v308_v7, %v165_v14  ;;  %v352_v5 = vadd.s32 64, %v344_v53 }
 0x12d   :  { %v353_v6 = vadd.s32 72, %v344_v53  ;;  %v355_v12 = vadd.s32 88, %v344_v53  ;;  %v356_v13 = vadd.s32 96, %v344_v53  ;;  %v357_v14 = vadd.s32 104, %v344_v53 }
 0x12e   :  { %v330_v16 = vmax.f32 %v326_v10, %v779_v9  ;;  %v323_v17 = vmax.f32 %v777_v8, %v782_v11  ;;  %v354_v10 = vadd.s32 80, %v344_v53 }
 0x12f   :  { %v273_v18 = vpop.f32.mrb[12].mxu0  ;;  %v313_v19 = vpop.f32.mrb[12].mxu1 }
 0x130   :  { %v327_v22 = vmax.f32 %v323_v17, %v784_v15  ;;  %v794_v23 = vadd.f32 %v273_v18, %v130_v39  ;;  %v275_v24 = vpop.f32.mrb[13].mxu0  ;;  %v315_v25 = vpop.f32.mrb[13].mxu1  ;;  %v803_v34 = vadd.f32 %v313_v19, %v170_v26  ;;  %v359_v17 = vadd.s32 120, %v344_v53 }
 0x132   :  { %v331_v28 = vmax.f32 %v327_v22, %v791_v21  ;;  %v324_v29 = vmax.f32 %v789_v20, %v794_v23 }
 0x133   :  { %v278_v31 = vpop.f32.mrb[14].mxu0  ;;  %v318_v32 = vpop.f32.mrb[14].mxu1 }
 0x134   :  { %v334_v33 = vmax.f32 %v330_v16, %v331_v28  ;;  %v328_v35 = vmax.f32 %v324_v29, %v796_v27  ;;  %v806_v37 = vadd.f32 %v278_v31, %v135_v40  ;;  %v280_v38 = vpop.f32.mrb[15].mxu0  ;;  %v320_v39 = vpop.f32.mrb[15].mxu1  ;;  %v813_v44 = vadd.f32 %v318_v32, %v175_v36  ;;  %v432_v40 = vld [vmem:[%s874_s3] sm:$0x3] }
 0x135   :  { %v497_v50 = vround.rtne.f32 %v432_v40  ;;  %v358_v16 = vadd.s32 112, %v344_v53 }
 0x136   :  { %v332_v42 = vmax.f32 %v328_v35, %v803_v34  ;;  %v325_v43 = vmax.f32 %v801_v30, %v806_v37 }
 0x137   :  { %v434_v54 = vmul.f32 16.0, %v497_v50 }
 0x138   :  { %v329_v45 = vmax.f32 %v325_v43, %v808_v41 }
 0x139   :  { %v436_v59 = vrot.slane %v434_v54, 1 }
 0x13a   :  { %v333_v46 = vmax.f32 %v329_v45, %v813_v44 }
 0x13b   :  { %v438_v18 = vadd.f32 %v497_v50, %v436_v59 }
 0x13c   :  { %v335_v47 = vmax.f32 %v332_v42, %v333_v46 }
 0x13d   :  { %v439_v36 = vadd.f32 132.0, %v438_v18 }
 0x13e   :  { %v336_v48 = vmax.f32 %v334_v33, %v335_v47 }
 0x13f   :  { %v498_v46 = vtrunc.f32 %v439_v36 }
 0x140   :  { %v337_v51 = vrot.slane %v336_v48, 4 }
 0x142   :  { %v338_v52 = vmax.f32 %v336_v48, %v337_v51  ;;  %v499_v48 = vcvt.f32.s32 %v498_v46 }
 0x144   :  { %v339_v55 = vrot.slane %v338_v52, 2  ;;  %v441_v51 = vrot.slane %v499_v48, 7 }
 0x146   :  { %v340_v56 = vmax.f32 %v338_v52, %v339_v55 }
 0x148   :  { %v341_v60 = vrot.slane %v340_v56, 1 }
 0x14a   :  { %v342_v7 = vmax.f32 %v340_v56, %v341_v60 }
 0x14c   :  { %vm360_vm0 = vcmp.ge.f32.partialorder %v769_v63, %v342_v7  ;;  %vm361_vm1 = vcmp.ge.f32.partialorder %v777_v8, %v342_v7  ;;  %vm362_vm2 = vcmp.ge.f32.partialorder %v789_v20, %v342_v7  ;;  %vm363_vm3 = vcmp.ge.f32.partialorder %v801_v30, %v342_v7 }
 0x14d   :  { %vm364_vm4 = vcmp.ge.f32.partialorder %v771_v0, %v342_v7  ;;  %vm365_vm5 = vcmp.ge.f32.partialorder %v782_v11, %v342_v7  ;;  %vm366_vm6 = vcmp.ge.f32.partialorder %v794_v23, %v342_v7  ;;  %vm367_vm7 = vcmp.ge.f32.partialorder %v806_v37, %v342_v7 }
 0x14e   :  { %vm368_vm8 = vcmp.ge.f32.partialorder %v773_v4, %v342_v7  ;;  %vm369_vm9 = vcmp.ge.f32.partialorder %v784_v15, %v342_v7  ;;  %vm370_vm10 = vcmp.ge.f32.partialorder %v796_v27, %v342_v7  ;;  %vm371_vm11 = vcmp.ge.f32.partialorder %v808_v41, %v342_v7 }
 0x14f   :  { %vm372_vm12 = vcmp.ge.f32.partialorder %v779_v9, %v342_v7  ;;  %vm373_vm13 = vcmp.ge.f32.partialorder %v791_v21, %v342_v7  ;;  %vm374_vm14 = vcmp.ge.f32.partialorder %v803_v34, %v342_v7  ;;  %vm375_vm15 = vcmp.ge.f32.partialorder %v813_v44, %v342_v7 }
 0x150   :  { %v376_v19 = vsel %vm360_vm0, %v344_v53, 128  ;;  %v377_v22 = vsel %vm361_vm1, %v345_v57, 128  ;;  %v378_v24 = vsel %vm362_vm2, %v346_v58, 128  ;;  %v379_v25 = vsel %vm363_vm3, %v347_v61, 128 }
 0x151   :  { %v380_v26 = vsel %vm364_vm4, %v348_v62, 128  ;;  %v381_v28 = vsel %vm365_vm5, %v349_v1, 128  ;;  %v382_v29 = vsel %vm366_vm6, %v350_v2, 128  ;;  %v383_v63 = vsel %vm367_vm7, %v351_v3, 128 }
 0x152   :  { %v384_v8 = vsel %vm368_vm8, %v352_v5, 128  ;;  %v385_v20 = vsel %vm369_vm9, %v353_v6, 128  ;;  %v386_v30 = vsel %vm370_vm10, %v354_v10, 128  ;;  %v387_v0 = vsel %vm371_vm11, %v355_v12, 128 }
 0x153   :  { %v388_v11 = vsel %vm372_vm12, %v356_v13, 128  ;;  %v389_v23 = vsel %vm373_vm13, %v357_v14, 128  ;;  %v390_v31 = vsel %vm374_vm14, %v358_v16, 128  ;;  %v391_v4 = vsel %vm375_vm15, %v359_v17, 128 }
 0x154   :  { %vm392_vm0 = vcmp.lt.s32.totalorder %v376_v19, %v380_v26  ;;  %vm394_vm1 = vcmp.lt.s32.totalorder %v377_v22, %v381_v28  ;;  %vm396_vm2 = vcmp.lt.s32.totalorder %v378_v24, %v382_v29  ;;  %vm398_vm3 = vcmp.lt.s32.totalorder %v379_v25, %v383_v63 }
 0x155   :  { %v393_v15 = vsel %vm392_vm0, %v376_v19, %v380_v26  ;;  %v395_v27 = vsel %vm394_vm1, %v377_v22, %v381_v28  ;;  %v397_v32 = vsel %vm396_vm2, %v378_v24, %v382_v29  ;;  %v399_v33 = vsel %vm398_vm3, %v379_v25, %v383_v63 }
 0x156   :  { %vm400_vm4 = vcmp.lt.s32.totalorder %v393_v15, %v384_v8  ;;  %vm402_vm5 = vcmp.lt.s32.totalorder %v395_v27, %v385_v20  ;;  %vm404_vm6 = vcmp.lt.s32.totalorder %v397_v32, %v386_v30  ;;  %vm406_vm7 = vcmp.lt.s32.totalorder %v399_v33, %v387_v0 }
 0x157   :  { %v401_v9 = vsel %vm400_vm4, %v393_v15, %v384_v8  ;;  %v403_v21 = vsel %vm402_vm5, %v395_v27, %v385_v20  ;;  %v405_v35 = vsel %vm404_vm6, %v397_v32, %v386_v30  ;;  %v407_v34 = vsel %vm406_vm7, %v399_v33, %v387_v0 }
 0x158   :  { %vm408_vm8 = vcmp.lt.s32.totalorder %v401_v9, %v388_v11  ;;  %vm410_vm9 = vcmp.lt.s32.totalorder %v403_v21, %v389_v23  ;;  %vm412_vm10 = vcmp.lt.s32.totalorder %v405_v35, %v390_v31  ;;  %vm414_vm11 = vcmp.lt.s32.totalorder %v407_v34, %v391_v4 }
 0x159   :  { %v409_v37 = vsel %vm408_vm8, %v401_v9, %v388_v11  ;;  %v411_v38 = vsel %vm410_vm9, %v403_v21, %v389_v23  ;;  %v413_v39 = vsel %vm412_vm10, %v405_v35, %v390_v31  ;;  %v415_v41 = vsel %vm414_vm11, %v407_v34, %v391_v4 }
 0x15a   :  { %vm416_vm12 = vcmp.lt.s32.totalorder %v409_v37, %v411_v38  ;;  %vm418_vm13 = vcmp.lt.s32.totalorder %v413_v39, %v415_v41  ;;  %vm442_vm2 = vcmask 1040384  }
 0x15b   :  { %v417_v42 = vsel %vm416_vm12, %v409_v37, %v411_v38  ;;  %v419_v43 = vsel %vm418_vm13, %v413_v39, %v415_v41 }
 0x15c   :  { %vm420_vm14 = vcmp.lt.s32.totalorder %v417_v42, %v419_v43 }
 0x15d   :  { %v421_v44 = vsel %vm420_vm14, %v417_v42, %v419_v43 }
 0x15e   :  { %v422_v45 = vrot.slane %v421_v44, 4 }
 0x160   :  { %vm423_vm15 = vcmp.lt.s32.totalorder %v421_v44, %v422_v45 }
 0x161   :  { %v424_v47 = vsel %vm423_vm15, %v421_v44, %v422_v45 }
 0x162   :  { %v425_v40 = vrot.slane %v424_v47, 2 }
 0x164   :  { %vm426_vm0 = vcmp.lt.s32.totalorder %v424_v47, %v425_v40 }
 0x165   :  { %v427_v49 = vsel %vm426_vm0, %v424_v47, %v425_v40 }
 0x166   :  { %v428_v50 = vrot.slane %v427_v49, 1 }
 0x168   :  { %vm429_vm1 = vcmp.lt.s32.totalorder %v427_v49, %v428_v50 }
 0x169   :  { %v430_v52 = vsel %vm429_vm1, %v427_v49, %v428_v50 }
 0x16a   :  { %v431_v53 = vadd.s32 4, %v430_v52 }
 0x16c   :  { %v443_v54 = vsel %vm442_vm2, %v431_v53, %v441_v51 }
 0x16d   :  { %444 = vst [vmem:[%s875_s4] sm:$0x3] %v443_v54 }

</bundles_post_ra>
